<compile_context>
chip_gen: v7x
topology: tpu7x:2x2x1
jax: 0.10.0
libtpu: 0.0.40
codegen_flags: <defaults>
</compile_context>

<pallas_src>
import functools

import jax
import jax.numpy as jnp
from jax.experimental import pallas as pl
from jax.experimental.pallas import tpu as pltpu


def _round_up(x, m):
    return ((x + m - 1) // m) * m


def _cdiv(a, b):
    return (a + b - 1) // b


def _vmem_capacity_bytes():
    try:
        info = pltpu.get_tpu_info()
        cap = int(getattr(info, "vmem_capacity_bytes", 0) or 0)
        if cap > 0:
            return min(cap, 128 * 1024 * 1024)
    except Exception:
        pass
    return 64 * 1024 * 1024  # conservative default (v7x per-TC VMEM)


_VMEM_CAP = _vmem_capacity_bytes()
# Generation-aware scoped-VMEM budget (review: replace the hard 48 MiB cap).
_VMEM_BUDGET = int(min(max(int(_VMEM_CAP * 0.75), 32 * 1024 * 1024),
                       112 * 1024 * 1024))


# --------------------------------------------------------------------------- #
# Fused single-sweep kernel: logits cached in VMEM, one weight pass total.
# --------------------------------------------------------------------------- #
def _fused_kernel(x_ref, w_ref, b_ref, o_ref, cache, m_sc, l_sc, *,
                  num_v_tiles, tv):
    j = pl.program_id(1)

    @pl.when(j == 0)
    def _():
        m_sc[...] = jnp.full_like(m_sc, -jnp.inf)
        l_sc[...] = jnp.zeros_like(l_sc)

    # (tm, H) @ (H, tv) -> (tm, tv); canonical MXU orientation (weight is (H, V)).
    a = jnp.dot(x_ref[...], w_ref[...], preferred_element_type=jnp.float32)
    a = a + b_ref[...]

    # Online row-wise logsumexp update (padded vocab columns carry a -1e30 bias
    # baked in at prepare time, so no per-tile mask is needed here).
    m_prev = m_sc[...]
    m_new = jnp.maximum(m_prev, jnp.max(a, axis=-1, keepdims=True))
    alpha = jnp.exp(m_prev - m_new)
    l_sc[...] = alpha * l_sc[...] + jnp.sum(jnp.exp(a - m_new), axis=-1,
                                            keepdims=True)
    m_sc[...] = m_new

    # Stash the unnormalized f32 logits for this vocab tile.  Dynamic index on
    # the leading scratch axis only (no dynamic lane-dim stores).
    cache[j] = a

    @pl.when(j == num_v_tiles - 1)
    def _():
        lse = m_sc[...] + jnp.log(l_sc[...])
        # Static, lane-aligned slices.  o_ref is the VMEM-resident (tm, V_pad)
        # row block; it is DMA'd to HBM only when the row-tile index advances.
        for t in range(num_v_tiles):
            o_ref[:, t * tv:(t + 1) * tv] = (cache[t] - lse).astype(o_ref.dtype)


# --------------------------------------------------------------------------- #
# Two-pass fallback (only for vocabularies too large for the fused VMEM cache).
# --------------------------------------------------------------------------- #
def _lse_kernel(x_ref, w_ref, b_ref, lse_ref, m_sc, l_sc):
    j = pl.program_id(1)

    @pl.when(j == 0)
    def _():
        m_sc[...] = jnp.full_like(m_sc, -jnp.inf)
        l_sc[...] = jnp.zeros_like(l_sc)

    a = jnp.dot(x_ref[...], w_ref[...], preferred_element_type=jnp.float32)
    a = a + b_ref[...]
    m_new = jnp.maximum(m_sc[...], jnp.max(a, axis=-1, keepdims=True))
    alpha = jnp.exp(m_sc[...] - m_new)
    l_sc[...] = alpha * l_sc[...] + jnp.sum(jnp.exp(a - m_new), axis=-1,
                                            keepdims=True)
    m_sc[...] = m_new

    @pl.when(j == pl.num_programs(1) - 1)
    def _():
        lse_ref[...] = m_sc[...] + jnp.log(l_sc[...])


def _logprob_kernel(x_ref, w_ref, b_ref, lse_ref, o_ref):
    a = jnp.dot(x_ref[...], w_ref[...], preferred_element_type=jnp.float32)
    o_ref[...] = (a + b_ref[...] - lse_ref[...]).astype(o_ref.dtype)


# --------------------------------------------------------------------------- #
# Tile planning (generation-aware VMEM budget).
# --------------------------------------------------------------------------- #
def _fused_vmem_bytes(tm, tv, H, V_pad, cbytes, obytes):
    return (2 * tm * H * cbytes          # x row tile (double-buffered)
            + 2 * H * tv * cbytes        # weight tile (double-buffered)
            + 2 * 8 * tv * 4             # bias tile (sublane-padded)
            + 2 * tm * V_pad * obytes    # resident output row block
            + tm * V_pad * 4             # f32 logits cache (scratch)
            + 3 * tm * tv * 4            # in-flight f32 intermediates / spills
            + 32 * tm)                   # running max / sum scratch + slack


def _twopass_vmem_bytes(tm, tv, H, V_pad, cbytes, obytes):
    return (2 * tm * H * cbytes + 2 * H * tv * cbytes + 2 * 8 * tv * 4
            + 2 * tm * tv * max(obytes, 4)   # pass-2 output tile
            + 3 * tm * tv * 4                # in-flight f32 intermediates
            + 32 * tm)


def _plan_tiles(M, H, V_pad, vocab_tile, cbytes, obytes, tm_target,
                force_two_pass):
    """Pick (mode, tm, tv) that fits the VMEM budget while minimizing total
    weight HBM traffic (the dominant stream): fused costs ceil(M/tm) weight
    sweeps, two-pass costs 2*ceil(M/tm)."""
    budget = _VMEM_BUDGET
    row_cap = _round_up(M, 16)
    tm_cap = min(_round_up(tm_target, 16), row_cap)
    tm_opts = [t for t in (2048, 1024, 512, 256, 128, 64, 32, 16) if t <= tm_cap]
    if not tm_opts or tm_opts[0] != tm_cap:
        tm_opts = [tm_cap] + tm_opts
    tv_opts = [tv for tv in range(vocab_tile, 127, -128) if V_pad % tv == 0]
    if not tv_opts:
        tv_opts = [vocab_tile]

    def best(fits):
        for tm in tm_opts:
            for tv in tv_opts:
                if fits(tm, tv):
                    return tm, tv
        return None

    fused = best(lambda tm, tv:
                 _fused_vmem_bytes(tm, tv, H, V_pad, cbytes, obytes) <= budget)
    two = best(lambda tm, tv:
               _twopass_vmem_bytes(tm, tv, H, V_pad, cbytes, obytes) <= budget)

    use_fused = (not force_two_pass and fused is not None and
                 (two is None or _cdiv(M, fused[0]) <= 2 * _cdiv(M, two[0])))
    if use_fused:
        return ("fused",) + fused
    if two is None:
        raise ValueError("FullSoftmaxDecoder tiles do not fit the VMEM budget "
                         f"(H={H}, V_pad={V_pad}, budget={budget} bytes).")
    return ("two_pass",) + two


# --------------------------------------------------------------------------- #
# One-time parameter preparation (keep OUTSIDE the per-step hot path).
# --------------------------------------------------------------------------- #
def pick_vocab_tile(nb_output, vocab_tile=None):
    """Lane-dense vocab tile: 2048 on 128 MiB-VMEM chips (v5e/v6e), else 1024,
    clamped to the (128-aligned) vocabulary size."""
    if vocab_tile is None:
        vocab_tile = 2048 if _VMEM_CAP >= 100 * 1024 * 1024 else 1024
    return max(128, min(_round_up(vocab_tile, 128), _round_up(nb_output, 128)))


def prepare_decoder_params(weight, bias, *, vocab_tile,
                           compute_dtype=jnp.bfloat16, pad_bias_value=-1e30):
    """One-time weight prep:
       * transpose the PyTorch (V, H) weight to (H, V)  -> canonical MXU layout,
       * cast to the MXU compute dtype (bf16 by default),
       * pad V up to a multiple of `vocab_tile`, baking the padding mask into the
         bias as a large *finite* negative (not -inf, to avoid NaNs downstream)."""
    V, H = weight.shape
    V_pad = _round_up(V, vocab_tile)
    w_t = jnp.asarray(weight).T.astype(compute_dtype)          # (H, V)
    b = jnp.asarray(bias).astype(jnp.float32)
    if V_pad != V:
        w_t = jnp.pad(w_t, ((0, 0), (0, V_pad - V)))
        b = jnp.pad(b, (0, V_pad - V), constant_values=pad_bias_value)
    return w_t, b.reshape(1, V_pad)


# --------------------------------------------------------------------------- #
# Forward pass (log_softmax(x @ W.T + b)).
# --------------------------------------------------------------------------- #
@functools.partial(jax.jit, static_argnames=("nb_output", "vocab_tile", "tm",
                                              "out_dtype", "force_two_pass"))
def full_softmax_decoder_forward(x, w_t, bias2d, *, nb_output, vocab_tile,
                                 tm=None, out_dtype=None, force_two_pass=False):
    """FullSoftmaxDecoder.forward(X) with pre-prepared params.

    x:       (..., nb_hidden)
    w_t:     (nb_hidden, V_pad)  pre-transposed / pre-cast / pre-padded weight
    bias2d:  (1, V_pad)          f32 bias with -1e30 in padded columns
    returns  (..., nb_output) log-probabilities (dtype = out_dtype or x.dtype).
    On v5e, prefer out_dtype=jnp.bfloat16 to halve the output store traffic.
    """
    orig_shape = x.shape
    H = orig_shape[-1]
    V = nb_output
    H_w, V_pad = w_t.shape
    assert H_w == H and bias2d.shape == (1, V_pad)
    assert V_pad % vocab_tile == 0 and V_pad >= V

    out_dtype = x.dtype if out_dtype is None else out_dtype
    compute_dtype = w_t.dtype
    cbytes = jnp.dtype(compute_dtype).itemsize
    obytes = jnp.dtype(out_dtype).itemsize

    x2 = x.reshape(-1, H).astype(compute_dtype)
    M = x2.shape[0]

    if tm is None:
        tm = 1024 if H <= 1024 else 512    # review: bigger default row tile

    mode, tm_eff, tv_eff = _plan_tiles(M, H, V_pad, vocab_tile, cbytes, obytes,
                                       tm, force_two_pass)
    M_pad = _round_up(M, tm_eff)
    if M_pad != M:
        x2 = jnp.pad(x2, ((0, M_pad - M), (0, 0)))

    grid = (M_pad // tm_eff, V_pad // tv_eff)
    nvt = V_pad // tv_eff

    # TODO(synk): v7x small-M decode (single row tile) leaves one TensorCore idle;
    # split V across the two cores with two partial LSEs if that case matters.
    # If a profile shows exposed weight DMA for small H, add
    # pipeline_mode=pl.Buffered(3) to w_spec.
    x_spec = pl.BlockSpec((tm_eff, H), lambda i, j: (i, 0))
    w_spec = pl.BlockSpec((H, tv_eff), lambda i, j: (0, j))
    b_spec = pl.BlockSpec((1, tv_eff), lambda i, j: (0, j))

    if mode == "fused":
        out = pl.pallas_call(
            functools.partial(_fused_kernel, num_v_tiles=nvt, tv=tv_eff),
            out_shape=jax.ShapeDtypeStruct((M_pad, V_pad), out_dtype),
            grid_spec=pltpu.PrefetchScalarGridSpec(
                num_scalar_prefetch=0,
                grid=grid,
                in_specs=[x_spec, w_spec, b_spec],
                out_specs=pl.BlockSpec((tm_eff, V_pad), lambda i, j: (i, 0)),
                scratch_shapes=[
                    pltpu.VMEM((nvt, tm_eff, tv_eff), jnp.float32),  # logits cache
                    pltpu.VMEM((tm_eff, 1), jnp.float32),            # running max
                    pltpu.VMEM((tm_eff, 1), jnp.float32),            # running sum
                ]),
            compiler_params=pltpu.CompilerParams(
                dimension_semantics=("parallel", "arbitrary"),
                vmem_limit_bytes=_VMEM_BUDGET),
        )(x2, w_t, bias2d)
    else:
        lse_spec = pl.BlockSpec((tm_eff, 1), lambda i, j: (i, 0))
        lse = pl.pallas_call(
            _lse_kernel,
            out_shape=jax.ShapeDtypeStruct((M_pad, 1), jnp.float32),
            grid_spec=pltpu.PrefetchScalarGridSpec(
                num_scalar_prefetch=0,
                grid=grid,
                in_specs=[x_spec, w_spec, b_spec],
                out_specs=lse_spec,
                scratch_shapes=[pltpu.VMEM((tm_eff, 1), jnp.float32),
                                pltpu.VMEM((tm_eff, 1), jnp.float32)]),
            compiler_params=pltpu.CompilerParams(
                dimension_semantics=("parallel", "arbitrary"),
                vmem_limit_bytes=_VMEM_BUDGET),
        )(x2, w_t, bias2d)

        out = pl.pallas_call(
            _logprob_kernel,
            out_shape=jax.ShapeDtypeStruct((M_pad, V_pad), out_dtype),
            grid_spec=pltpu.PrefetchScalarGridSpec(
                num_scalar_prefetch=0,
                grid=grid,
                in_specs=[x_spec, w_spec, b_spec, lse_spec],
                out_specs=pl.BlockSpec((tm_eff, tv_eff), lambda i, j: (i, j))),
            compiler_params=pltpu.CompilerParams(
                dimension_semantics=("parallel", "parallel"),
                vmem_limit_bytes=_VMEM_BUDGET),
        )(x2, w_t, bias2d, lse)

    # Crop only when padding actually occurred (production shapes with V a
    # multiple of the vocab tile and M a multiple of tm skip this extra copy).
    if M_pad != M or V_pad != V:
        out = out[:M, :V]
    return out.reshape(*orig_shape[:-1], V)


def full_softmax_decoder(x, weight, bias, *, compute_dtype=jnp.bfloat16,
                         vocab_tile=None, **kwargs):
    """Convenience path from the raw PyTorch-layout (V, H) weight.  For the hot
    path, call prepare_decoder_params once and reuse its result with
    full_softmax_decoder_forward (avoids a per-call weight transpose/cast)."""
    V = weight.shape[0]
    tv = pick_vocab_tile(V, vocab_tile)
    w_t, b2 = prepare_decoder_params(weight, bias, vocab_tile=tv,
                                     compute_dtype=compute_dtype)
    return full_softmax_decoder_forward(x, w_t, b2, nb_output=V, vocab_tile=tv,
                                        **kwargs)


def _reference_forward(x, weight, bias):
    a = jnp.einsum("...h,vh->...v", x, weight) + bias
    return jax.nn.log_softmax(a, axis=-1)


if __name__ == "__main__":
    key = jax.random.PRNGKey(0)
    kx, kw, kx2, kw2, kb2 = jax.random.split(key, 5)
    init_range = 0.1

    # ---- Test A: module-consistent shapes (batch=2, seq=8, hidden=32, vocab=256).
    batch, seq, nb_hidden, nb_output = 2, 8, 32, 256
    x = jax.random.normal(kx, (batch, seq, nb_hidden), dtype=jnp.float32)
    # projection.weight.uniform_(-init_range, init_range); bias.fill_(0)
    weight = jax.random.uniform(kw, (nb_output, nb_hidden), dtype=jnp.float32,
                                minval=-init_range, maxval=init_range)
    bias = jnp.zeros((nb_output,), dtype=jnp.float32)
    ref = _reference_forward(x, weight, bias)

    # Fused single-sweep path, f32 MXU operands, two 128-lane vocab tiles
    # (exercises the online logsumexp + the cached write-out).
    w_t32, b2_32 = prepare_decoder_params(weight, bias, vocab_tile=128,
                                          compute_dtype=jnp.float32)
    lp_f32 = full_softmax_decoder_forward(x, w_t32, b2_32, nb_output=nb_output,
                                          vocab_tile=128)
    jax.block_until_ready(lp_f32)
    assert lp_f32.shape == (batch, seq, nb_output)
    assert jnp.allclose(lp_f32, ref, atol=1e-5, rtol=1e-5)
    assert jnp.allclose(jnp.sum(jnp.exp(lp_f32), axis=-1), 1.0, atol=1e-4)

    # Two-pass fallback (forced) -> same result.
    lp_2p = full_softmax_decoder_forward(x, w_t32, b2_32, nb_output=nb_output,
                                         vocab_tile=128, force_two_pass=True)
    jax.block_until_ready(lp_2p)
    assert jnp.allclose(lp_2p, ref, atol=1e-5, rtol=1e-5)

    # Default production configuration through the convenience wrapper:
    # bf16 MXU operands (f32 accumulation), auto tile sizes.
    lp_bf16 = full_softmax_decoder(x, weight, bias)
    jax.block_until_ready(lp_bf16)
    assert lp_bf16.shape == (batch, seq, nb_output)
    assert jnp.allclose(lp_bf16, ref, atol=3e-2, rtol=3e-2)
    assert jnp.allclose(jnp.sum(jnp.exp(lp_bf16), axis=-1), 1.0, atol=1e-3)

    # ---- Test B: ragged shapes -> row padding + vocab padding baked into the bias.
    b_b, s_b, h_b, v_b = 3, 5, 32, 200
    x_b = jax.random.normal(kx2, (b_b, s_b, h_b), dtype=jnp.float32)
    w_b = jax.random.uniform(kw2, (v_b, h_b), dtype=jnp.float32,
                             minval=-init_range, maxval=init_range)
    bias_b = 0.01 * jax.random.normal(kb2, (v_b,), dtype=jnp.float32)
    ref_b = _reference_forward(x_b, w_b, bias_b)

    w_tb, b2_b = prepare_decoder_params(w_b, bias_b, vocab_tile=128,
                                        compute_dtype=jnp.float32)
    lp_b = full_softmax_decoder_forward(x_b, w_tb, b2_b, nb_output=v_b,
                                        vocab_tile=128)
    jax.block_until_ready(lp_b)
    assert lp_b.shape == (b_b, s_b, v_b)
    assert jnp.allclose(lp_b, ref_b, atol=1e-5, rtol=1e-5)
    assert jnp.allclose(jnp.sum(jnp.exp(lp_b), axis=-1), 1.0, atol=1e-4)

    # TODO(synk): neg_log_prob / NLLLoss helpers of the module are not part of
    # forward(); build them from these log-probs with a gather + sum.
    print("KERNEL_OK")
</pallas_src>

<mosaic_0001>
module attributes {stable_mosaic.version = 11 : i64} {
  func.func @_fused_kernel(%arg0: i32, %arg1: i32, %arg2: memref<16x32xf32, #tpu.memory_space<vmem>>, %arg3: memref<32x128xf32, #tpu.memory_space<vmem>>, %arg4: memref<1x128xf32, #tpu.memory_space<vmem>>, %arg5: memref<16x256xf32, #tpu.memory_space<vmem>>, %arg6: memref<2x16x128xf32, #tpu.memory_space<vmem>>, %arg7: memref<16x1xf32, #tpu.memory_space<vmem>>, %arg8: memref<16x1xf32, #tpu.memory_space<vmem>>) attributes {dimension_semantics = [#tpu.dimension_semantics<parallel>, #tpu.dimension_semantics<arbitrary>], iteration_bounds = array<i64: 1, 2>, scalar_prefetch = 0 : i64, scratch_operands = 3 : i64, tpu.core_type = #tpu.core_type<tc>, window_params = [{transform_indices = @transform_0, window_bounds = array<i64: 16, 32>}, {transform_indices = @transform_1, window_bounds = array<i64: 32, 128>}, {transform_indices = @transform_2, window_bounds = array<i64: 1, 128>}, {transform_indices = @transform_3, window_bounds = array<i64: 16, 256>}]} {
    %c0_i32 = arith.constant 0 : i32
    %0 = arith.cmpi eq, %arg1, %c0_i32 : i32
    %1 = arith.extui %0 : i1 to i32
    %c0_i32_0 = arith.constant 0 : i32
    %2 = arith.cmpi ne, %1, %c0_i32_0 : i32
    scf.if %2 {
      %cst_19 = arith.constant 0xFF800000 : f32
      %32 = vector.broadcast %cst_19 : f32 to vector<16x1xf32>
      %c0_20 = arith.constant 0 : index
      %c0_21 = arith.constant 0 : index
      %33 = vector.load %arg7[%c0_20, %c0_21] : memref<16x1xf32, #tpu.memory_space<vmem>>, vector<16x1xf32>
      tpu.vector_store %arg7[%c0_20, %c0_21], %32 {strides = array<i32>} : memref<16x1xf32, #tpu.memory_space<vmem>>, vector<16x1xf32>,
      %cst_22 = arith.constant 0.000000e+00 : f32
      %34 = vector.broadcast %cst_22 : f32 to vector<16x1xf32>
      %c0_23 = arith.constant 0 : index
      %c0_24 = arith.constant 0 : index
      %35 = vector.load %arg8[%c0_23, %c0_24] : memref<16x1xf32, #tpu.memory_space<vmem>>, vector<16x1xf32>
      tpu.vector_store %arg8[%c0_23, %c0_24], %34 {strides = array<i32>} : memref<16x1xf32, #tpu.memory_space<vmem>>, vector<16x1xf32>,
    } else {
    }
    %c0 = arith.constant 0 : index
    %c0_1 = arith.constant 0 : index
    %3 = vector.load %arg2[%c0, %c0_1] : memref<16x32xf32, #tpu.memory_space<vmem>>, vector<16x32xf32>
    %c0_2 = arith.constant 0 : index
    %c0_3 = arith.constant 0 : index
    %4 = vector.load %arg3[%c0_2, %c0_3] : memref<32x128xf32, #tpu.memory_space<vmem>>, vector<32x128xf32>
    %cst = arith.constant dense<0.000000e+00> : vector<16x128xf32>
    %5 = tpu.matmul %3, %4, %cst {dimension_numbers = #tpu.dot_dimension_numbers<[1], [0], [0], [1], [0, 0, 1, 1], [], []>} : vector<16x32xf32>, vector<32x128xf32>, vector<16x128xf32> -> vector<16x128xf32>
    %c0_4 = arith.constant 0 : index
    %c0_5 = arith.constant 0 : index
    %6 = vector.load %arg4[%c0_4, %c0_5] : memref<1x128xf32, #tpu.memory_space<vmem>>, vector<1x128xf32>
    %7 = vector.broadcast %6 : vector<1x128xf32> to vector<16x128xf32>
    %8 = arith.addf %5, %7 : vector<16x128xf32>
    %c0_6 = arith.constant 0 : index
    %c0_7 = arith.constant 0 : index
    %9 = vector.load %arg7[%c0_6, %c0_7] : memref<16x1xf32, #tpu.memory_space<vmem>>, vector<16x1xf32>
    %cst_8 = arith.constant dense<0xFF800000> : vector<16xf32>
    %10 = vector.multi_reduction <maximumf>, %8, %cst_8 [1] : vector<16x128xf32> to vector<16xf32>
    %11 = vector.shape_cast %10 : vector<16xf32> to vector<16x1xf32>
    %12 = arith.maximumf %9, %11 : vector<16x1xf32>
    %13 = arith.subf %9, %12 : vector<16x1xf32>
    %14 = math.exp %13 : vector<16x1xf32>
    %c0_9 = arith.constant 0 : index
    %c0_10 = arith.constant 0 : index
    %15 = vector.load %arg8[%c0_9, %c0_10] : memref<16x1xf32, #tpu.memory_space<vmem>>, vector<16x1xf32>
    %16 = arith.mulf %14, %15 : vector<16x1xf32>
    %17 = vector.broadcast %12 : vector<16x1xf32> to vector<16x128xf32>
    %18 = arith.subf %8, %17 : vector<16x128xf32>
    %19 = math.exp %18 : vector<16x128xf32>
    %cst_11 = arith.constant dense<0.000000e+00> : vector<16xf32>
    %20 = vector.multi_reduction <add>, %19, %cst_11 [1] : vector<16x128xf32> to vector<16xf32>
    %21 = vector.shape_cast %20 : vector<16xf32> to vector<16x1xf32>
    %22 = arith.addf %16, %21 : vector<16x1xf32>
    %c0_12 = arith.constant 0 : index
    %c0_13 = arith.constant 0 : index
    %23 = vector.load %arg8[%c0_12, %c0_13] : memref<16x1xf32, #tpu.memory_space<vmem>>, vector<16x1xf32>
    tpu.vector_store %arg8[%c0_12, %c0_13], %22 {strides = array<i32>} : memref<16x1xf32, #tpu.memory_space<vmem>>, vector<16x1xf32>,
    %c0_14 = arith.constant 0 : index
    %c0_15 = arith.constant 0 : index
    %24 = vector.load %arg7[%c0_14, %c0_15] : memref<16x1xf32, #tpu.memory_space<vmem>>, vector<16x1xf32>
    tpu.vector_store %arg7[%c0_14, %c0_15], %12 {strides = array<i32>} : memref<16x1xf32, #tpu.memory_space<vmem>>, vector<16x1xf32>,
    %25 = arith.index_cast %arg1 : i32 to index
    %c0_16 = arith.constant 0 : index
    %c0_17 = arith.constant 0 : index
    %26 = vector.load %arg6[%25, %c0_16, %c0_17] : memref<2x16x128xf32, #tpu.memory_space<vmem>>, vector<1x16x128xf32>
    %27 = vector.shape_cast %26 : vector<1x16x128xf32> to vector<16x128xf32>
    %28 = vector.shape_cast %8 : vector<16x128xf32> to vector<1x16x128xf32>
    tpu.vector_store %arg6[%25, %c0_16, %c0_17], %28 {strides = array<i32>} : memref<2x16x128xf32, #tpu.memory_space<vmem>>, vector<1x16x128xf32>,
    %c1_i32 = arith.constant 1 : i32
    %29 = arith.cmpi eq, %arg1, %c1_i32 : i32
    %30 = arith.extui %29 : i1 to i32
    %c0_i32_18 = arith.constant 0 : i32
    %31 = arith.cmpi ne, %30, %c0_i32_18 : i32
    scf.if %31 {
      %c0_19 = arith.constant 0 : index
      %c0_20 = arith.constant 0 : index
      %32 = vector.load %arg7[%c0_19, %c0_20] : memref<16x1xf32, #tpu.memory_space<vmem>>, vector<16x1xf32>
      %c0_21 = arith.constant 0 : index
      %c0_22 = arith.constant 0 : index
      %33 = vector.load %arg8[%c0_21, %c0_22] : memref<16x1xf32, #tpu.memory_space<vmem>>, vector<16x1xf32>
      %34 = math.log %33 : vector<16x1xf32>
      %35 = arith.addf %32, %34 : vector<16x1xf32>
      %c0_23 = arith.constant 0 : index
      %c0_24 = arith.constant 0 : index
      %c0_25 = arith.constant 0 : index
      %36 = vector.load %arg6[%c0_23, %c0_24, %c0_25] : memref<2x16x128xf32, #tpu.memory_space<vmem>>, vector<1x16x128xf32>
      %37 = vector.shape_cast %36 : vector<1x16x128xf32> to vector<16x128xf32>
      %38 = vector.broadcast %35 : vector<16x1xf32> to vector<16x128xf32>
      %39 = arith.subf %37, %38 : vector<16x128xf32>
      %c0_26 = arith.constant 0 : index
      %c0_27 = arith.constant 0 : index
      %40 = vector.load %arg5[%c0_26, %c0_27] : memref<16x256xf32, #tpu.memory_space<vmem>>, vector<16x128xf32>
      tpu.vector_store %arg5[%c0_26, %c0_27], %39 {strides = array<i32>} : memref<16x256xf32, #tpu.memory_space<vmem>>, vector<16x128xf32>,
      %c1 = arith.constant 1 : index
      %c0_28 = arith.constant 0 : index
      %c0_29 = arith.constant 0 : index
      %41 = vector.load %arg6[%c1, %c0_28, %c0_29] : memref<2x16x128xf32, #tpu.memory_space<vmem>>, vector<1x16x128xf32>
      %42 = vector.shape_cast %41 : vector<1x16x128xf32> to vector<16x128xf32>
      %43 = vector.broadcast %35 : vector<16x1xf32> to vector<16x128xf32>
      %44 = arith.subf %42, %43 : vector<16x128xf32>
      %c0_30 = arith.constant 0 : index
      %c128 = arith.constant 128 : index
      %45 = vector.load %arg5[%c0_30, %c128] : memref<16x256xf32, #tpu.memory_space<vmem>>, vector<16x128xf32>
      tpu.vector_store %arg5[%c0_30, %c128], %44 {strides = array<i32>} : memref<16x256xf32, #tpu.memory_space<vmem>>, vector<16x128xf32>,
    } else {
    }
    return
  }
  func.func @transform_0(%arg0: i32, %arg1: i32) -> (i32, i32) {
    %c0_i32 = arith.constant 0 : i32
    %c0_i32_0 = arith.constant 0 : i32
    return %arg0, %c0_i32 : i32, i32
  }
  func.func @transform_1(%arg0: i32, %arg1: i32) -> (i32, i32) {
    %c0_i32 = arith.constant 0 : i32
    %c0_i32_0 = arith.constant 0 : i32
    return %c0_i32, %arg1 : i32, i32
  }
  func.func @transform_2(%arg0: i32, %arg1: i32) -> (i32, i32) {
    %c0_i32 = arith.constant 0 : i32
    %c0_i32_0 = arith.constant 0 : i32
    return %c0_i32, %arg1 : i32, i32
  }
  func.func @transform_3(%arg0: i32, %arg1: i32) -> (i32, i32) {
    %c0_i32 = arith.constant 0 : i32
    %c0_i32_0 = arith.constant 0 : i32
    return %arg0, %c0_i32 : i32, i32
  }
}

</mosaic_0001>

<bundles_post_ra>
// kernel: full_softmax_decoder_forward.1
= control target key start
LH: loop header
LB: loop body
LE: loop exit
PB: predicated region body
PF: predicated region fallthrough
CT: control target
= control target key end

     0   :  { %8 = vsyncpa [#allocation6], 0  ;;  %s1040_s0 = inlined_call_operand.hbm [shape: f32[16,32], index: 0, kind: input, shape index: {}]   ;;  %s1041_s1 = inlined_call_operand.hbm [shape: f32[32,256], index: 1, kind: input, shape index: {}]   ;;  %s1042_s2 = inlined_call_operand.vmem [shape: f32[1,256], index: 2, kind: input, shape index: {}]   ;;  %s1043_s3 = inlined_call_operand.hbm [shape: f32[16,256], index: 3, kind: output, shape index: {}]  }
   0x1   :  { %9 = vsyncpa [#allocation9], 0 }
   0x2   :  { %11 = vsyncpa [#allocation9 + $0x1], 0 }
   0x3   :  { %12 = vsyncpa [#allocation7], 0  ;;  %s838_s12 = smov 0   ;;  %s840_s13 = smov 0  }
   0x4   :  { %s842_s14 = smov 0   ;;  %s844_s15 = smov 0  }
   0x5   :  { %s846_s16 = smov 0   ;;  %s848_s17 = smov 0  }
   0x6 LB: > { %s521_s18 = sadd.s32 4294967295, %s804_s17   ;;  %p70_p0 = scmp.ne.s32.totalorder %s792_s14, %s788_s13  ;;  %s804_s17 = sphi %s848_s17, %s18_s17   ;;  %s800_s16 = sphi %s846_s16, %s1064_s16   ;;  %s796_s15 = sphi %s844_s15, %s1063_s15   ;;  %s792_s14 = sphi %s842_s14, %s1062_s14   ;;  %s788_s13 = sphi %s840_s13, %s1061_s13   ;;  %s784_s12 = sphi %s838_s12, %s1060_s12  }
   0x7   : > { %p71_p1 = scmp.eq.s32.totalorder %s804_s17, 0  ;;  %p76_p2 = scmp.ne.s32.totalorder %s788_s13, %s784_s12 }
   0x8   : > { %p873_p3 = scmp.eq.s32.totalorder %s521_s18, 0  ;;  %p522_p4 = scmp.ge.s32.totalorder %s804_s17, 1 }
   0x9   : > { %p72_p5 = por %p71_p1, %p70_p0  ;;  %p139_p6 = scmp.lt.s32.totalorder %s804_s17, 3 }
   0xa   : > { %s1049_s19 = scalar_select %p873_p3, 1, 0 }
   0xb   : > { %p881_p7 = por %p873_p3, %p76_p2  ;;  %p885_p8 = pnand %p522_p4, %p139_p6 }
   0xc   : > { %s806_s22 = smov [#allocation5]   ;;  %p584_p11 = scmp.lt.s32.totalorder %s804_s17, 2 }
   0xd   : > { %s1050_s20 = scalar_select %p881_p7, 1, 0 }
   0xe   : > { %s1051_s21 = scalar_select %p885_p8, 1, 0 }
   0xf   : > { %s154_s23 = sshll.u32 %s806_s22, 4  ;;  %p575_p9 = pneg %p885_p8  ;;  %s155_s23 = int_to_ptr.vmem [resolvable:$true] %s154_s23 }
  0x10   : > { %s63_s25 = sadd.s32 1, %s792_s14  ;;  %p899_p12 = pnand %p584_p11, %p72_p5 }
  0x11   : > { %p893_p10 = pnand %p575_p9, %p873_p3  ;;  %s662_s29 = scalar_lea.hbm %s1040_s0, 256 }
  0x12   : > { %s1053_s26 = scalar_select %p899_p12, 1, 0 }
  0x13   : > { %p663_p13 = scmp.ne.s32.totalorder %s1040_s0, %s662_s29  ;;  %p664_p0 = pneg %p893_p10 }
  0x14   : > { %p669_p4 = scmp.lt.u32.totalorder %s662_s29, %s1040_s0 }
  0x15   : > { %p665_p1 = pnand %p664_p0, %p663_p13 }
  0x17   : > { %p666_p2 = pneg %p665_p1 }
  0x19   : > { %p671_p5 = pnand %p669_p4, %p666_p2 }
  0x1b   : > { %674 = shalt.err (!%p671_p5)
}
  0x1c   : > { %s675_s7 = scalar_lea.vmem %s155_s23, 256  ;;  %p683_p7 = scmp.lt.s32.totalorder %s155_s23, %s155_s23 }
  0x1d   : > { %p676_p6 = scmp.ne.s32.totalorder %s155_s23, %s675_s7  ;;  %p684_p3 = scmp.lt.s32.totalorder %s675_s7, %s675_s7 }
  0x1f   : > { %p678_p9 = pnand %p676_p6, %p664_p0  ;;  %p685_p8 = por %p684_p3, %p683_p7 }
  0x21   : > { %p679_p11 = pneg %p678_p9 }
  0x23   : > { %p686_p12 = pnand %p685_p8, %p679_p11 }
  0x25   : > { %689 = shalt.err (!%p686_p12)
}
  0x26   : > { %s807_s8 = smov 128   ;;  %s808_s9 = smov 8  }
  0x27   : > { %578 = dma.hbm_to_vmem [thread:$0]  (!%p893_p10), %s1040_s0, 256, %s155_s23, [#allocation6], %s807_s8, %s807_s8, %s808_s9  }
  0x28   : > { %s27_s12 = sadd.s32 1, %s800_s16  ;;  %s168_s22 = sand.u32 1, %s792_s14  }
  0x29   : > { %p28_p3 = scmp.ge.s32.totalorder %s27_s12, 2  ;;  %s525_s27 = sshll.u32 %s168_s22, 5 }
  0x2a   : > { %s526_s28 = sshll.u32 %s800_s16, 7  ;;  %s172_s23 = scalar_lea.vmem [#allocation8], %s525_s27 }
  0x2b   : > { %s1066_s12 = smov (%p28_p3, %s27_s12), 0  ;;  %s930_s24 = scalar_lea.hbm %s1041_s1, %s526_s28 }
  0x2c   : > { %s60_s4 = ssub.s32 %s800_s16, %s1066_s12  ;;  %s178_s5 = sshll.u32 %s172_s23, 4  ;;  %s934_s5 = int_to_ptr.vmem [resolvable:$true] %s178_s5 }
  0x2d   : > { %p61_p7 = scmp.eq.s32.totalorder %s60_s4, 0  ;;  %s941_s7 = scalar_lea.sflag [#allocation9], %s168_s22 }
  0x2e   : > { %s690_s10 = scalar_lea.hbm %s930_s24, 512  ;;  %p1054_p10 = scmp.ne.s32.totalorder %s1053_s26, 0 }
  0x2f   : > { %s939_s6 = scalar_select %p61_p7, %s792_s14, %s63_s25  }
  0x30   : > { %p691_p8 = scmp.ne.s32.totalorder %s930_s24, %s690_s10  ;;  %p692_p12 = pneg %p1054_p10 }
  0x31   : > { %s695_s27 = scalar_lea.hbm %s1041_s1, 1024  ;;  %p696_p1 = scmp.lt.u32.totalorder %s930_s24, %s1041_s1 }
  0x32   : > { %p693_p13 = pnand %p692_p12, %p691_p8  ;;  %p697_p2 = scmp.lt.u32.totalorder %s695_s27, %s690_s10 }
  0x33   : > { %p699_p5 = scmp.lt.u32.totalorder %s690_s10, %s930_s24 }
  0x34   : > { %p694_p0 = pneg %p693_p13  ;;  %p698_p4 = por %p697_p2, %p696_p1 }
  0x36   : > { %p700_p6 = por %p699_p5, %p698_p4 }
  0x38   : > { %p701_p9 = pnand %p700_p6, %p694_p0 }
  0x3a   : > { %704 = shalt.err (!%p701_p9)
}
  0x3b   : > { %s705_s25 = scalar_lea.vmem %s934_s5, 512  ;;  %s809_s22 = smov [#allocation8]  }
  0x3c   : > { %p706_p11 = scmp.ne.s32.totalorder %s934_s5, %s705_s25  ;;  %s710_s4 = sshll.u32 %s809_s22, 4  ;;  %s711_s4 = int_to_ptr.vmem [resolvable:$false] %s710_s4 }
  0x3d   : > { %s712_s23 = scalar_lea.vmem %s711_s4, 1024  ;;  %p713_p8 = scmp.lt.s32.totalorder %s934_s5, %s711_s4 }
  0x3e   : > { %p708_p3 = pnand %p706_p11, %p692_p12  ;;  %p714_p13 = scmp.lt.s32.totalorder %s712_s23, %s705_s25 }
  0x40   : > { %p709_p7 = pneg %p708_p3  ;;  %p715_p1 = por %p714_p13, %p713_p8 }
  0x42   : > { %p716_p2 = pnand %p715_p1, %p709_p7 }
  0x44   : > { %719 = shalt.err (!%p716_p2)
}
  0x45   : > { %s810_s10 = smov 256   ;;  %p1055_p12 = scmp.ne.s32.totalorder %s1051_s21, 0 }
  0x46   : > { %582 = dma.hbm_to_vmem [thread:$0]  (!%p1054_p10), %s930_s24, 512, %s934_s5, %s941_s7, %s810_s10, %s807_s8, %s808_s9  }
  0x47   : > { %196 = sbr.rel (%p1055_p12) target bundleno = 934 (0x3a6), region = 32  ;;  %p1056_p0 = scmp.ne.s32.totalorder (!%p1055_p12), %s1049_s19, 0 }
  0x4e   : > { %771 = dma.done.wait (%p1056_p0), [#allocation6], 256  }
  0x4f   : > { %773 = vsyncadd (%p1056_p0), [#allocation6], 4294967040  ;;  %s202_s11 = sand.u32 1, %s788_s13   ;;  %p1057_p4 = scmp.ne.s32.totalorder %s1050_s20, 0 }
  0x50   : > { %s529_s28 = sshll.u32 %s202_s11, 5  ;;  %s203_s26 = scalar_lea.sflag [#allocation9], %s202_s11 }
  0x51   : > { %s206_s27 = scalar_lea.vmem [#allocation8], %s529_s28 }
  0x52   : > { %775 = dma.done.wait (%p1057_p4), %s203_s26, 512  }
  0x53   : > { %777 = vsyncadd (%p1057_p4), %s203_s26, 4294966784  ;;  %p228_p10 = scmp.lt.s32.totalorder %s796_s15, 1  ;;  %p530_p5 = scmp.ne.s32.totalorder %s796_s15, 0 }
  0x54   : > { %vm236_vm0 = vcmask (!%p530_p5), 7168   ;;  %v811_v0 = vmov (!%p530_p5), -inf   ;;  %v812_v1 = vmov (!%p530_p5), 0.0  }
  0x55   : > { %s229_s21 = scalar_select %p228_p10, %s796_s15, 1 }
  0x56   : > { %235 = sbr.rel (%p530_p5) target bundleno = 93 (0x5d), region = 44  ;;  %237 = vst.msk [vmem:[#allocation3] sm:$0xff] (!%p530_p5), %vm236_vm0, %v811_v0  ;;  %238 = vst.msk [vmem:[#allocation3 + $0x8] sm:$0xff] (!%p530_p5), %vm236_vm0, %v811_v0 }
  0x57   : > { %s230_s19 = scalar_lea.vmem %s1042_s2, %s229_s21  ;;  %239 = vst.msk [vmem:[#allocation4] sm:$0xff] (!%p530_p5), %vm236_vm0, %v812_v1  ;;  %240 = vst.msk [vmem:[#allocation4 + $0x8] sm:$0xff] (!%p530_p5), %vm236_vm0, %v812_v1 }
  0x5d PF: > { %v243_v2 = vld [vmem:[%s206_s27] sm:$0xff]  ;;  %v244_v3 = vld [vmem:[%s206_s27 + $0x8] sm:$0xff]  ;;  %v245_v4 = vld [vmem:[%s206_s27 + $0x10] sm:$0xff]  ;;  %vm254_vm1 = vcmask 261120   ;;  %s534_s20 = sshll.u32 %s796_s15, 4  ;;  %v813_v15 = vmov 0  }
  0x5e   : > { %v557_v5 = vpack.c.bf16 %v244_v3, %v243_v2  ;;  %v246_v6 = vld [vmem:[%s206_s27 + $0x18] sm:$0xff]  ;;  %v241_v7 = vld [vmem:[#allocation5] sm:$0xff]  ;;  %s382_s24 = scalar_lea.vmem [#allocation2], %s534_s20  ;;  %647 = vset.pattern.permute.xlu1 %v813_v15  ;;  %648 = vset.pattern.permute.xlu0 %v813_v15  ;;  %vm376_vm2 = vcmask 7168   ;;  %v350_v35 = vld [vmem:[#allocation4] sm:$0xff]  ;;  %p535_p6 = scmp.ne.s32.totalorder %s796_s15, 1 }
  0x5f   : > { %v561_v8 = vpack.c.bf16 %v246_v6, %v245_v4  ;;  %554 = vmatprep.mubr.msk.f32.mxu0 %vm254_vm1, %v241_v7  ;;  %v242_v9 = vld [vmem:[#allocation5 + $0x8] sm:$0xff]  ;;  %v531_v10 = vld [vmem:[%s230_s19] ss:$0 sm:$0xff]  ;;  %v351_v39 = vld [vmem:[#allocation4 + $0x8] sm:$0xff]  ;;  %v814_v45 = vmov (!%p535_p6), 0  }
  0x60   : > { %558 = vmatprep.subr.bf16.mxu0 %v557_v5  ;;  %v336_v16 = vld [vmem:[#allocation3] sm:$0xff]  ;;  %v337_v19 = vld [vmem:[#allocation3 + $0x8] sm:$0xff]  ;;  %657 = vset.pattern.permute.xlu0 (!%p535_p6), %v814_v45 }
  0x61   : > { %560 = vmatpush3.bf16.msra.mxu0 %v557_v5 }
  0x62   : > { %562 = vmatprep.subr.bf16.mxu0 %v561_v8 }
  0x65   : > { %564 = vmatpush3.bf16.msra.mxu0 %v561_v8 }
  0x68   : > { %555 = vmatmul.mubr.msk.f32.vlgmr.msra.gmra.mrb[0].mxu0 %vm254_vm1, %v242_v9 }
 0x13b   : > { %v556_v11 = vpop.f32.mrb[0].mxu0 }
 0x13c   : > { %v333_v12 = vadd.f32 %v556_v11, %v531_v10  ;;  %v327_v13 = vpop.f32.mrb[1].mxu0 }
 0x13d   : > { %v328_v14 = vadd.f32 %v531_v10, %v327_v13 }
 0x13e   : > { %384 = vst [vmem:[%s382_s24 + $0x8] sm:$0xff] %v333_v12 }
 0x13f   : > { %383 = vst [vmem:[%s382_s24] sm:$0xff] %v328_v14  ;;  %338 = vmax.xlane.f32.xlu0 %v328_v14 }
 0x143   : > { %340 = vmax.xlane.f32.xlu0 %v333_v12 }
 0x146   : > { %v399_v55 = vld [vmem:[#allocation2] sm:$0xff] (!%p535_p6)  ;;  %v416_v56 = vld [vmem:[#allocation2 + $0x10] sm:$0xff] (!%p535_p6)  ;;  %v400_v60 = vld [vmem:[#allocation2 + $0x8] sm:$0xff] (!%p535_p6) }
 0x147   : > { %v417_v61 = vld [vmem:[#allocation2 + $0x18] sm:$0xff] (!%p535_p6) }
 0x1cc   : > { %v339_v17 = vpop.xlane.xlu0 %338 }
 0x1cd   : > { %v342_v18 = vmax.f32 %v336_v16, %v339_v17 }
 0x1cf   : > { %v344_v20 = vsub.f32 %v336_v16, %v342_v18  ;;  %379 = vst.msk [vmem:[#allocation3] sm:$0xff] %vm376_vm2, %v342_v18  ;;  %356 = vperm.xlu1 %647, %v342_v18  }
 0x1d0   : > { %v341_v21 = vpop.xlane.xlu0 %340 }
 0x1d1   : > { %v343_v22 = vmax.f32 %v337_v19, %v341_v21  ;;  %v346_v32 = vmul.f32 1.442695, %v344_v20 }
 0x1d3   : > { %v345_v23 = vsub.f32 %v337_v19, %v343_v22  ;;  %380 = vst.msk [vmem:[#allocation3 + $0x8] sm:$0xff] %vm376_vm2, %v343_v22  ;;  %361 = vperm.xlu1 %647, %v343_v22  }
 0x1d5   : > { %v348_v33 = vmul.f32 1.442695, %v345_v23 }
 0x1d6   : > { %v389_v48 = vld [vmem:[#allocation3] sm:$0xff] (!%p535_p6) }
 0x1da   : > { %v390_v51 = vld [vmem:[#allocation3 + $0x8] sm:$0xff] (!%p535_p6) }
 0x24e   : > { %v357_v24 = vpop.permute.xlu1 %356 }
 0x24f   : > { %v364_v25 = vsub.f32 %v328_v14, %v357_v24 }
 0x251   : > { %v366_v26 = vmul.f32 1.442695, %v364_v25 }
 0x252   : > { %v362_v27 = vpop.permute.xlu1 %361 }
 0x253   : > { %649 = vpow2.f32 %v366_v26  ;;  %v365_v28 = vsub.f32 %v333_v12, %v362_v27 }
 0x255   : > { %v368_v29 = vmul.f32 1.442695, %v365_v28 }
 0x257   : > { %651 = vpow2.f32 %v368_v29 }
 0x258   : > { %653 = vpow2.f32 %v346_v32 }
 0x259   : > { %655 = vpow2.f32 %v348_v33 }
 0x25d   : > { %v650_v30 = vpop.eup %649 }
 0x25e   : > { %370 = vadd.xlane.f32.xlu0 %v650_v30 }
 0x261   : > { %v652_v31 = vpop.eup %651 }
 0x262   : > { %372 = vadd.xlane.f32.xlu1 %v652_v31  ;;  %v654_v34 = vpop.eup %653 }
 0x263   : > { %v352_v36 = vmul.f32 %v654_v34, %v350_v35  ;;  %v656_v37 = vpop.eup %655 }
 0x264   : > { %v353_v41 = vmul.f32 %v656_v37, %v351_v39 }
 0x2eb   : > { %v371_v38 = vpop.xlane.xlu0 %370 }
 0x2ec   : > { %v374_v40 = vadd.f32 %v371_v38, %v352_v36  ;;  %388 = sbr.rel (%p535_p6) target bundleno = 908 (0x38c), region = 48 }
 0x2ee   : > { %377 = vst.msk [vmem:[#allocation4] sm:$0xff] %vm376_vm2, %v374_v40 }
 0x2ef   : > { %v373_v42 = vpop.xlane.xlu1 %372 }
 0x2f0   : > { %v375_v43 = vadd.f32 %v373_v42, %v353_v41 }
 0x2f2   : > { %378 = vst.msk [vmem:[#allocation4 + $0x8] sm:$0xff] %vm376_vm2, %v375_v43 }
 0x2f5   : > { %v391_v44 = vld [vmem:[#allocation4] sm:$0xff] }
 0x2f6   : > { %658 = vlog2.f32 %v391_v44 }
 0x2f9   : > { %v392_v46 = vld [vmem:[#allocation4 + $0x8] sm:$0xff] }
 0x2fa   : > { %660 = vlog2.f32 %v392_v46 }
 0x300   : > { %v659_v47 = vpop.eup %658 }
 0x301   : > { %v394_v50 = vmul.f32 0.6931472, %v659_v47 }
 0x303   : > { %v397_v53 = vadd.f32 %v394_v50, %v389_v48 }
 0x304   : > { %v661_v49 = vpop.eup %660 }
 0x305   : > { %v396_v52 = vmul.f32 0.6931472, %v661_v49  ;;  %403 = vperm.xlu0 %657, %v397_v53  }
 0x307   : > { %v398_v54 = vadd.f32 %v396_v52, %v390_v51 }
 0x309   : > { %408 = vperm.xlu0 %657, %v398_v54  }
 0x384   : > { %v404_v57 = vpop.permute.xlu0 %403 }
 0x385   : > { %v411_v58 = vsub.f32 %v399_v55, %v404_v57  ;;  %v418_v59 = vsub.f32 %v416_v56, %v404_v57 }
 0x387   : > { %413 = vst [vmem:[#allocation10] sm:$0xff] %v411_v58  ;;  %420 = vst [vmem:[#allocation10 + $0x8] sm:$0xff] %v418_v59 }
 0x388   : > { %v409_v62 = vpop.permute.xlu0 %408 }
 0x389   : > { %v412_v63 = vsub.f32 %v400_v60, %v409_v62  ;;  %v419_v0 = vsub.f32 %v417_v61, %v409_v62 }
 0x38b   : > { %414 = vst [vmem:[#allocation10 + $0x10] sm:$0xff] %v412_v63  ;;  %421 = vst [vmem:[#allocation10 + $0x18] sm:$0xff] %v419_v0 }
 0x38c PF: > { %p996_p9 = scmp.eq.s32.totalorder %s521_s18, 1  ;;  %s815_s5 = smov [#allocation10]  }
 0x38d   : > { %s432_s7 = sshll.u32 %s815_s5, 4  ;;  %s433_s7 = int_to_ptr.vmem [resolvable:$true] %s432_s7 }
 0x38e   : > { %s720_s29 = scalar_lea.vmem %s433_s7, 512  ;;  %p727_p8 = scmp.lt.s32.totalorder %s433_s7, %s433_s7 }
 0x38f   : > { %p721_p11 = scmp.ne.s32.totalorder %s433_s7, %s720_s29  ;;  %p728_p13 = scmp.lt.s32.totalorder %s720_s29, %s720_s29 }
 0x391   : > { %p722_p3 = pnand %p721_p11, %p996_p9  ;;  %p729_p1 = por %p728_p13, %p727_p8 }
 0x393   : > { %p723_p7 = pneg %p722_p3 }
 0x395   : > { %p730_p2 = pnand %p729_p1, %p723_p7 }
 0x397   : > { %733 = shalt.err (!%p730_p2)
}
 0x398   : > { %s734_s18 = scalar_lea.hbm %s1043_s3, 512 }
 0x399   : > { %p735_p12 = scmp.ne.s32.totalorder %s1043_s3, %s734_s18  ;;  %p740_p10 = scmp.lt.u32.totalorder %s734_s18, %s1043_s3 }
 0x39b   : > { %p736_p0 = pnand %p735_p12, %p996_p9 }
 0x39d   : > { %p737_p4 = pneg %p736_p0 }
 0x39f   : > { %p742_p5 = pnand %p740_p10, %p737_p4 }
 0x3a1   : > { %745 = shalt.err (!%p742_p5)
}
 0x3a2   : > { %s816_s11 = smov 256   ;;  %s817_s28 = smov 16  }
 0x3a3   : > { %572 = dma.vmem_to_hbm [thread:$0]  (%p996_p9), %s433_s7, 512, %s1043_s3, [#allocation7], %s816_s11, %s816_s11, %s817_s28  }
 0x3a4   : > { %779 = dma.done.wait (%p996_p9), [#allocation7], 512  }
 0x3a5   : > { %781 = vsyncadd (%p996_p9), [#allocation7], 4294966784 }
 0x3a6 PF: > { %s18_s17 = sadd.s32 1, %s804_s17   ;;  %s1059_s21 = smov %s1066_s12 }
 0x3a7   : > { %p15_p6 = scmp.ge.s32.totalorder %s18_s17, 4   ;;  %s1060_s12 = smov %s788_s13 }
 0x3a8   : > { %s1061_s13 = smov %s792_s14  ;;  %s1062_s14 = smov %s939_s6 }
 0x3a9   : > { %s1063_s15 = smov %s800_s16  ;;  %s1064_s16 = smov %s1059_s21 }
 0x3aa   :  { %17 = sbr.rel (!%p15_p6) target bundleno = 6 (0x6), region = 89 }
 0x3b1   :  { %448 = vsyncpa [#allocation6], 1 }
 0x3b2   :  { %450 = vsyncpa [#allocation6 + $0x1], 1 }
 0x3b3   :  { %451 = vsyncpa [#allocation9], 1 }
 0x3b4   :  { %453 = vsyncpa [#allocation9 + $0x1], 1 }
 0x3b5   :  { %454 = vsyncpa [#allocation7], 1 }
 0x3b6   :  { %456 = vsyncpa [#allocation7 + $0x1], 1 }

</bundles_post_ra>
